<compile_context>
chip_gen: v5e
topology: v5e:2x2
jax: 0.10.0
libtpu: 0.0.40
codegen_flags: <defaults>
</compile_context>

<pallas_src>
import functools
import math

import jax
import jax.numpy as jnp
from jax.experimental import pallas as pl
from jax.experimental.pallas import tpu as pltpu


def _round_up(x: int, m: int) -> int:
    return ((x + m - 1) // m) * m


_INV_SQRT2 = 1.0 / math.sqrt(2.0)


def _mlp_block_kernel(x_ref, gamma_ref, beta_ref, w1_ref, b1_ref, w2_ref, b2_ref,
                      o_ref, *, eps: float):
    # Current row-tile of tokens, computed in f32.
    x = x_ref[...].astype(jnp.float32)                                  # (tn, D)

    # ---- LayerNorm over the embedding dim (f32, VPU) ----
    mean = jnp.mean(x, axis=-1, keepdims=True)
    xc = x - mean
    var = jnp.mean(jnp.square(xc), axis=-1, keepdims=True)
    xn = xc * jax.lax.rsqrt(var + eps)
    xn = xn * gamma_ref[...] + beta_ref[...]

    # ---- Linear(D -> M): bf16 operands on the MXU, f32 accumulation ----
    h = jnp.dot(xn.astype(jnp.bfloat16), w1_ref[...],
                preferred_element_type=jnp.float32) + b1_ref[...]       # (tn, M)

    # ---- Exact GELU (erf form, torch nn.GELU default) in f32 ----
    h = 0.5 * h * (1.0 + jax.lax.erf(h * _INV_SQRT2))

    # (Dropout: identity in eval mode)

    # ---- Linear(M -> D): bf16 operands on the MXU, f32 accumulation ----
    y = jnp.dot(h.astype(jnp.bfloat16), w2_ref[...],
                preferred_element_type=jnp.float32) + b2_ref[...]       # (tn, D)

    # (Dropout: identity in eval mode)
    o_ref[...] = y.astype(o_ref.dtype)


def _vmem_limit_bytes(tn: int, D: int, M: int, x_itemsize: int) -> int:
    io = 2 * 2 * tn * D * max(x_itemsize, 4)        # x + out row tiles, double-buffered
    weights = 2 * D * M * 2                         # w1 + w2 in bf16, single-buffered
    small = 4 * (3 * D + M)                         # gamma/beta/b1/b2 (f32)
    work = tn * M * 4 + 2 * tn * D * 4              # (tn, M) hidden + f32 working tiles
    est = int(1.5 * (io + weights + small + work)) + (4 << 20)
    return max(32 << 20, min(est, 64 << 20))        # stay within v7x's 64 MiB physical VMEM


def mlp_block(x, gamma, beta, w1, b1, w2, b2, *, eps=1e-5, row_tile=256):
    """x: (B, S, D); weights: w1 (D, M), b1 (M,), w2 (M, D), b2 (D,).

    row_tile: rows of the flattened (B*S, D) token matrix per grid step.
    Sweep {128, 256, 512} per chip generation; 256 is a good default for v6e/v7x.
    """
    B, S, D = x.shape
    M = w1.shape[1]
    N = B * S

    x2 = x.reshape(N, D)

    # Row tile: multiple of 8, no larger than (padded) N.
    tn = max(8, _round_up(min(row_tile, N), 8))
    Np = _round_up(N, tn)
    if Np != N:
        # Zero-pad the tail tile; padded rows are row-independent and dropped after.
        x2 = jnp.pad(x2, ((0, Np - N), (0, 0)))

    # bf16 weights: half the HBM traffic / VMEM footprint, fast MXU path.
    w1b = w1.astype(jnp.bfloat16)
    w2b = w2.astype(jnp.bfloat16)
    gr = gamma.reshape(1, D).astype(jnp.float32)
    br = beta.reshape(1, D).astype(jnp.float32)
    b1r = b1.reshape(1, M).astype(jnp.float32)
    b2r = b2.reshape(1, D).astype(jnp.float32)

    grid = (Np // tn,)
    single = pl.Buffered(1)  # invariant operands: no double-buffering

    out = pl.pallas_call(
        functools.partial(_mlp_block_kernel, eps=eps),
        out_shape=jax.ShapeDtypeStruct((Np, D), x.dtype),
        grid_spec=pltpu.PrefetchScalarGridSpec(
            num_scalar_prefetch=0,
            grid=grid,
            in_specs=[
                pl.BlockSpec((tn, D), lambda i: (i, 0)),                          # x row tile
                pl.BlockSpec((1, D), lambda i: (0, 0), pipeline_mode=single),     # gamma
                pl.BlockSpec((1, D), lambda i: (0, 0), pipeline_mode=single),     # beta
                pl.BlockSpec((D, M), lambda i: (0, 0), pipeline_mode=single),     # w1 (bf16)
                pl.BlockSpec((1, M), lambda i: (0, 0), pipeline_mode=single),     # b1
                pl.BlockSpec((M, D), lambda i: (0, 0), pipeline_mode=single),     # w2 (bf16)
                pl.BlockSpec((1, D), lambda i: (0, 0), pipeline_mode=single),     # b2
            ],
            # NOTE: for real ViT shapes D (=768) is a multiple of 128 -> lane-dense stores.
            out_specs=pl.BlockSpec((tn, D), lambda i: (i, 0)),
        ),
        compiler_params=pltpu.CompilerParams(
            dimension_semantics=("parallel",),
            vmem_limit_bytes=_vmem_limit_bytes(tn, D, M, x.dtype.itemsize),
        ),
    )(x2, gr, br, w1b, b1r, w2b, b2r)

    return out[:N].reshape(B, S, D)


def _reference(x, gamma, beta, w1, b1, w2, b2, eps=1e-5):
    xf = x.astype(jnp.float32)
    mean = jnp.mean(xf, axis=-1, keepdims=True)
    var = jnp.mean(jnp.square(xf - mean), axis=-1, keepdims=True)
    xn = (xf - mean) * jax.lax.rsqrt(var + eps) * gamma + beta
    h = xn @ w1 + b1
    h = 0.5 * h * (1.0 + jax.lax.erf(h / math.sqrt(2.0)))
    return (h @ w2 + b2).astype(x.dtype)


if __name__ == "__main__":
    # Small shapes consistent with the module: batch=2, seq=8, embedding_dim=32, mlp_size=64.
    B, S, D, M = 2, 8, 32, 64
    key = jax.random.PRNGKey(0)
    kx, k1, k2, kb1, kb2 = jax.random.split(key, 5)

    x = jax.random.normal(kx, (B, S, D), dtype=jnp.float32)

    # Deterministic parameter init (LayerNorm: ones/zeros; Linears: small uniform, torch-like).
    gamma = jnp.ones((D,), jnp.float32)
    beta = jnp.zeros((D,), jnp.float32)
    lim1 = 1.0 / math.sqrt(D)
    lim2 = 1.0 / math.sqrt(M)
    w1 = jax.random.uniform(k1, (D, M), jnp.float32, -lim1, lim1)
    b1 = jax.random.uniform(kb1, (M,), jnp.float32, -lim1, lim1)
    w2 = jax.random.uniform(k2, (M, D), jnp.float32, -lim2, lim2)
    b2 = jax.random.uniform(kb2, (D,), jnp.float32, -lim2, lim2)

    y = mlp_block(x, gamma, beta, w1, b1, w2, b2)
    y = jax.block_until_ready(y)

    y_ref = _reference(x, gamma, beta, w1, b1, w2, b2)
    assert y.shape == (B, S, D)
    # Tolerance loosened vs the pure-fp32 reference because matmul operands are bf16
    # (accumulation stays f32 via preferred_element_type).
    assert jnp.allclose(y, y_ref, atol=2e-2, rtol=2e-2), "mismatch vs reference"

    print("KERNEL_OK")
</pallas_src>

<mosaic_0001>
module attributes {stable_mosaic.version = 11 : i64} {
  func.func @_mlp_block_kernel(%arg0: i32, %arg1: memref<16x32xf32, #tpu.memory_space<vmem>>, %arg2: memref<1x32xf32, #tpu.memory_space<vmem>>, %arg3: memref<1x32xf32, #tpu.memory_space<vmem>>, %arg4: memref<32x64xbf16, #tpu.memory_space<vmem>>, %arg5: memref<1x64xf32, #tpu.memory_space<vmem>>, %arg6: memref<64x32xbf16, #tpu.memory_space<vmem>>, %arg7: memref<1x32xf32, #tpu.memory_space<vmem>>, %arg8: memref<16x32xf32, #tpu.memory_space<vmem>>) attributes {dimension_semantics = [#tpu.dimension_semantics<parallel>], iteration_bounds = array<i64: 1>, scalar_prefetch = 0 : i64, scratch_operands = 0 : i64, tpu.core_type = #tpu.core_type<tc>, window_params = [{transform_indices = @transform_0, window_bounds = array<i64: 16, 32>}, {pipeline_mode = #tpu.pipeline_mode<synchronous>, transform_indices = @transform_1, window_bounds = array<i64: 1, 32>}, {pipeline_mode = #tpu.pipeline_mode<synchronous>, transform_indices = @transform_2, window_bounds = array<i64: 1, 32>}, {pipeline_mode = #tpu.pipeline_mode<synchronous>, transform_indices = @transform_3, window_bounds = array<i64: 32, 64>}, {pipeline_mode = #tpu.pipeline_mode<synchronous>, transform_indices = @transform_4, window_bounds = array<i64: 1, 64>}, {pipeline_mode = #tpu.pipeline_mode<synchronous>, transform_indices = @transform_5, window_bounds = array<i64: 64, 32>}, {pipeline_mode = #tpu.pipeline_mode<synchronous>, transform_indices = @transform_6, window_bounds = array<i64: 1, 32>}, {transform_indices = @transform_7, window_bounds = array<i64: 16, 32>}]} {
    %c0 = arith.constant 0 : index
    %c0_0 = arith.constant 0 : index
    %0 = vector.load %arg1[%c0, %c0_0] : memref<16x32xf32, #tpu.memory_space<vmem>>, vector<16x32xf32>
    %cst = arith.constant dense<0.000000e+00> : vector<16xf32>
    %1 = vector.multi_reduction <add>, %0, %cst [1] : vector<16x32xf32> to vector<16xf32>
    %2 = vector.shape_cast %1 : vector<16xf32> to vector<16x1xf32>
    %cst_1 = arith.constant 3.200000e+01 : f32
    %3 = vector.broadcast %cst_1 : f32 to vector<16x1xf32>
    %4 = arith.divf %2, %3 : vector<16x1xf32>
    %5 = vector.broadcast %4 : vector<16x1xf32> to vector<16x32xf32>
    %6 = arith.subf %0, %5 : vector<16x32xf32>
    %7 = arith.mulf %6, %6 : vector<16x32xf32>
    %cst_2 = arith.constant dense<0.000000e+00> : vector<16xf32>
    %8 = vector.multi_reduction <add>, %7, %cst_2 [1] : vector<16x32xf32> to vector<16xf32>
    %9 = vector.shape_cast %8 : vector<16xf32> to vector<16x1xf32>
    %cst_3 = arith.constant 3.200000e+01 : f32
    %10 = vector.broadcast %cst_3 : f32 to vector<16x1xf32>
    %11 = arith.divf %9, %10 : vector<16x1xf32>
    %cst_4 = arith.constant 9.99999974E-6 : f32
    %12 = vector.broadcast %cst_4 : f32 to vector<16x1xf32>
    %13 = arith.addf %11, %12 : vector<16x1xf32>
    %14 = math.rsqrt %13 : vector<16x1xf32>
    %15 = vector.broadcast %14 : vector<16x1xf32> to vector<16x32xf32>
    %16 = arith.mulf %6, %15 : vector<16x32xf32>
    %c0_5 = arith.constant 0 : index
    %c0_6 = arith.constant 0 : index
    %17 = vector.load %arg2[%c0_5, %c0_6] : memref<1x32xf32, #tpu.memory_space<vmem>>, vector<1x32xf32>
    %18 = vector.broadcast %17 : vector<1x32xf32> to vector<16x32xf32>
    %19 = arith.mulf %16, %18 : vector<16x32xf32>
    %c0_7 = arith.constant 0 : index
    %c0_8 = arith.constant 0 : index
    %20 = vector.load %arg3[%c0_7, %c0_8] : memref<1x32xf32, #tpu.memory_space<vmem>>, vector<1x32xf32>
    %21 = vector.broadcast %20 : vector<1x32xf32> to vector<16x32xf32>
    %22 = arith.addf %19, %21 : vector<16x32xf32>
    %23 = arith.truncf %22 : vector<16x32xf32> to vector<16x32xbf16>
    %c0_9 = arith.constant 0 : index
    %c0_10 = arith.constant 0 : index
    %24 = vector.load %arg4[%c0_9, %c0_10] : memref<32x64xbf16, #tpu.memory_space<vmem>>, vector<32x64xbf16>
    %cst_11 = arith.constant dense<0.000000e+00> : vector<16x64xf32>
    %25 = tpu.matmul %23, %24, %cst_11 {dimension_numbers = #tpu.dot_dimension_numbers<[1], [0], [0], [1], [0, 0, 1, 1], [], []>} : vector<16x32xbf16>, vector<32x64xbf16>, vector<16x64xf32> -> vector<16x64xf32>
    %c0_12 = arith.constant 0 : index
    %c0_13 = arith.constant 0 : index
    %26 = vector.load %arg5[%c0_12, %c0_13] : memref<1x64xf32, #tpu.memory_space<vmem>>, vector<1x64xf32>
    %27 = vector.broadcast %26 : vector<1x64xf32> to vector<16x64xf32>
    %28 = arith.addf %25, %27 : vector<16x64xf32>
    %cst_14 = arith.constant 5.000000e-01 : f32
    %29 = vector.broadcast %cst_14 : f32 to vector<16x64xf32>
    %30 = arith.mulf %29, %28 : vector<16x64xf32>
    %cst_15 = arith.constant 0.707106769 : f32
    %31 = vector.broadcast %cst_15 : f32 to vector<16x64xf32>
    %32 = arith.mulf %28, %31 : vector<16x64xf32>
    %33 = math.erf %32 : vector<16x64xf32>
    %cst_16 = arith.constant 1.000000e+00 : f32
    %34 = vector.broadcast %cst_16 : f32 to vector<16x64xf32>
    %35 = arith.addf %34, %33 : vector<16x64xf32>
    %36 = arith.mulf %30, %35 : vector<16x64xf32>
    %37 = arith.truncf %36 : vector<16x64xf32> to vector<16x64xbf16>
    %c0_17 = arith.constant 0 : index
    %c0_18 = arith.constant 0 : index
    %38 = vector.load %arg6[%c0_17, %c0_18] : memref<64x32xbf16, #tpu.memory_space<vmem>>, vector<64x32xbf16>
    %cst_19 = arith.constant dense<0.000000e+00> : vector<16x32xf32>
    %39 = tpu.matmul %37, %38, %cst_19 {dimension_numbers = #tpu.dot_dimension_numbers<[1], [0], [0], [1], [0, 0, 1, 1], [], []>} : vector<16x64xbf16>, vector<64x32xbf16>, vector<16x32xf32> -> vector<16x32xf32>
    %c0_20 = arith.constant 0 : index
    %c0_21 = arith.constant 0 : index
    %40 = vector.load %arg7[%c0_20, %c0_21] : memref<1x32xf32, #tpu.memory_space<vmem>>, vector<1x32xf32>
    %41 = vector.broadcast %40 : vector<1x32xf32> to vector<16x32xf32>
    %42 = arith.addf %39, %41 : vector<16x32xf32>
    %c0_22 = arith.constant 0 : index
    %c0_23 = arith.constant 0 : index
    %43 = vector.load %arg8[%c0_22, %c0_23] : memref<16x32xf32, #tpu.memory_space<vmem>>, vector<16x32xf32>
    tpu.vector_store %arg8[%c0_22, %c0_23], %42 {strides = array<i32>} : memref<16x32xf32, #tpu.memory_space<vmem>>, vector<16x32xf32>,
    return
  }
  func.func @transform_0(%arg0: i32) -> (i32, i32) {
    %c0_i32 = arith.constant 0 : i32
    %c0_i32_0 = arith.constant 0 : i32
    return %arg0, %c0_i32 : i32, i32
  }
  func.func @transform_1(%arg0: i32) -> (i32, i32) {
    %c0_i32 = arith.constant 0 : i32
    %c0_i32_0 = arith.constant 0 : i32
    %c0_i32_1 = arith.constant 0 : i32
    return %c0_i32, %c0_i32_0 : i32, i32
  }
  func.func @transform_2(%arg0: i32) -> (i32, i32) {
    %c0_i32 = arith.constant 0 : i32
    %c0_i32_0 = arith.constant 0 : i32
    %c0_i32_1 = arith.constant 0 : i32
    return %c0_i32, %c0_i32_0 : i32, i32
  }
  func.func @transform_3(%arg0: i32) -> (i32, i32) {
    %c0_i32 = arith.constant 0 : i32
    %c0_i32_0 = arith.constant 0 : i32
    %c0_i32_1 = arith.constant 0 : i32
    return %c0_i32, %c0_i32_0 : i32, i32
  }
  func.func @transform_4(%arg0: i32) -> (i32, i32) {
    %c0_i32 = arith.constant 0 : i32
    %c0_i32_0 = arith.constant 0 : i32
    %c0_i32_1 = arith.constant 0 : i32
    return %c0_i32, %c0_i32_0 : i32, i32
  }
  func.func @transform_5(%arg0: i32) -> (i32, i32) {
    %c0_i32 = arith.constant 0 : i32
    %c0_i32_0 = arith.constant 0 : i32
    %c0_i32_1 = arith.constant 0 : i32
    return %c0_i32, %c0_i32_0 : i32, i32
  }
  func.func @transform_6(%arg0: i32) -> (i32, i32) {
    %c0_i32 = arith.constant 0 : i32
    %c0_i32_0 = arith.constant 0 : i32
    %c0_i32_1 = arith.constant 0 : i32
    return %c0_i32, %c0_i32_0 : i32, i32
  }
  func.func @transform_7(%arg0: i32) -> (i32, i32) {
    %c0_i32 = arith.constant 0 : i32
    %c0_i32_0 = arith.constant 0 : i32
    return %arg0, %c0_i32 : i32, i32
  }
}

</mosaic_0001>

<bundles_post_ra>
// kernel: tpu_custom_call.1
= control target key start
LH: loop header
LB: loop body
LE: loop exit
PB: predicated region body
PF: predicated region fallthrough
CT: control target
= control target key end

     0   :  { %vm30_vm0 = vcmask 261120   ;;  %s481_s0 = inlined_call_operand.vmem [shape: f32[16,32], index: 0, kind: input, shape index: {}]   ;;  %s482_s1 = inlined_call_operand.vmem [shape: f32[1,32], index: 1, kind: input, shape index: {}]   ;;  %s483_s2 = inlined_call_operand.vmem [shape: f32[1,32], index: 2, kind: input, shape index: {}]   ;;  %s484_s3 = inlined_call_operand.vmem [shape: bf16[32,64], index: 3, kind: input, shape index: {}]   ;;  %s485_s4 = inlined_call_operand.vmem [shape: f32[1,64], index: 4, kind: input, shape index: {}]   ;;  %s486_s5 = inlined_call_operand.vmem [shape: bf16[64,32], index: 5, kind: input, shape index: {}]   ;;  %s487_s6 = inlined_call_operand.vmem [shape: f32[1,32], index: 6, kind: input, shape index: {}]   ;;  %s488_s7 = inlined_call_operand.hbm [shape: f32[16,32], index: 7, kind: output, shape index: {}]  }
   0x1   :  { %v28_v0 = vld [vmem:[%s481_s0] sm:$0xff] }
   0x2   :  { %v31_v1 = vsel %vm30_vm0, %v28_v0, 0.0 }
   0x3   :  { %32 = vadd.xlane.f32.xlu0 %v31_v1 }
   0x4   :  { %12 = vsyncpa [#allocation3], 0  ;;  %v29_v2 = vld [vmem:[%s481_s0 + $0x8] sm:$0xff]  ;;  %v373_v4 = vmov 32.0   ;;  %v323_v23 = vld [vmem:[%s484_s3] sm:$0xff]  ;;  %s374_s19 = smov [#allocation2]  }
   0x5   :  { %v34_v3 = vsel %vm30_vm0, %v29_v2, 0.0  ;;  %337 = vrcp.f32 %v373_v4  ;;  %v324_v21 = vld [vmem:[%s484_s3 + $0x8] sm:$0xff]  ;;  %v333_v42 = vld [vmem:[%s482_s1] ss:$0 sm:$0xff]  ;;  %s281_s20 = sshll.u32 %s374_s19, 4  ;;  %s283_s23 = sshll.u32 %s488_s7, 4  ;;  %s282_s20 = int_to_ptr.vmem [resolvable:$true] %s281_s20  ;;  %s284_s23 = int_to_ptr.hbm [resolvable:$true] %s283_s23 }
   0x6   :  { %124 = vmatpush.bf16.msra.mxu0 %v324_v21  ;;  %v334_v47 = vld [vmem:[%s483_s2] ss:$0 sm:$0xff]  ;;  %s375_s24 = smov 128   ;;  %s376_s25 = smov 8  }
   0x7   :  { %v335_v52 = vld [vmem:[%s485_s4] ss:$0 sm:$0xff] }
   0xa   :  { %125 = vmatpush.bf16.msra.mxu0 %v323_v23  ;;  %v326_v23 = vld [vmem:[%s486_s5 + $0x8] sm:$0xff] }
   0xb   :  { %35 = vadd.xlane.f32.xlu0 %v34_v3  ;;  %v338_v5 = vpop.eup %337 }
   0xc   :  { %v38_v6 = vmul.f32 32.0, %v338_v5  ;;  %vm42_vm1 = vweird.f32 %v338_v5 }
   0xe   :  { %v39_v7 = vsub.f32 1.0, %v38_v6 }
  0x10   :  { %v40_v8 = vmul.f32 %v338_v5, %v39_v7  ;;  %v328_v7 = vld [vmem:[%s486_s5 + $0x18] sm:$0xff] }
  0x11   :  { %265 = vmatpush.bf16.msra.mxu1 %v328_v7 }
  0x12   :  { %v41_v9 = vadd.f32 %v338_v5, %v40_v8 }
  0x14   :  { %v43_v10 = vsel %vm42_vm1, %v338_v5, %v41_v9  ;;  %vm257_vm1 = vcmask 523264  }
  0x76   :  { %v33_v11 = vpop.xlane.xlu0 %32 }
  0x77   :  { %v44_v12 = vmul.f32 %v43_v10, %v33_v11 }
  0x79   :  { %v46_v13 = vsub.f32 %v28_v0, %v44_v12 }
  0x7b   :  { %v48_v14 = vmul.f32 %v46_v13, %v46_v13 }
  0x7d   :  { %v50_v15 = vsel %vm30_vm0, %v48_v14, 0.0 }
  0x7e   :  { %51 = vadd.xlane.f32.xlu1 %v50_v15  ;;  %v36_v16 = vpop.xlane.xlu0 %35  ;;  %v327_v15 = vld [vmem:[%s486_s5 + $0x10] sm:$0xff] }
  0x7f   :  { %v45_v17 = vmul.f32 %v43_v10, %v36_v16  ;;  %266 = vmatpush.bf16.msra.mxu1 %v327_v15 }
  0x81   :  { %v47_v18 = vsub.f32 %v29_v2, %v45_v17 }
  0x83   :  { %v49_v19 = vmul.f32 %v47_v18, %v47_v18  ;;  %267 = vmatpush.bf16.msra.mxu1 %v326_v23 }
  0x85   :  { %v53_v20 = vsel %vm30_vm0, %v49_v19, 0.0 }
  0x86   :  { %54 = vadd.xlane.f32.xlu1 %v53_v20 }
  0xf1   :  { %v52_v22 = vpop.xlane.xlu1 %51 }
  0xf2   :  { %v56_v24 = vmul.f32 %v52_v22, %v43_v10 }
  0xf4   :  { %v58_v25 = vadd.f32 1e-05, %v56_v24 }
  0xf6   :  { %339 = vrsqrt.f32 %v58_v25  ;;  %vm66_vm3 = vweird.f32 %v58_v25 }
  0xf9   :  { %v55_v26 = vpop.xlane.xlu1 %54 }
  0xfa   :  { %v57_v27 = vmul.f32 %v55_v26, %v43_v10 }
  0xfc   :  { %v340_v28 = vpop.eup %339  ;;  %v59_v29 = vadd.f32 1e-05, %v57_v27 }
  0xfd   :  { %v61_v30 = vmul.f32 %v340_v28, %v58_v25  ;;  %vm67_vm2 = vweird.f32 %v340_v28 }
  0xfe   :  { %341 = vrsqrt.f32 %v59_v29  ;;  %vm68_vm4 = vmor %vm66_vm3, %vm67_vm2  ;;  %vm76_vm6 = vweird.f32 %v59_v29 }
  0xff   :  { %v62_v31 = vmul.f32 %v340_v28, %v61_v30 }
 0x101   :  { %v63_v32 = vmul.f32 0.5, %v62_v31 }
 0x103   :  { %v64_v33 = vsub.f32 1.5, %v63_v32 }
 0x104   :  { %v342_v34 = vpop.eup %341 }
 0x105   :  { %v65_v35 = vmul.f32 %v340_v28, %v64_v33  ;;  %v71_v36 = vmul.f32 %v342_v34, %v59_v29  ;;  %vm77_vm5 = vweird.f32 %v342_v34  ;;  %v325_v29 = vld [vmem:[%s486_s5] sm:$0xff] }
 0x106   :  { %vm78_vm7 = vmor %vm76_vm6, %vm77_vm5  ;;  %268 = vmatpush.bf16.msra.mxu1 %v325_v29 }
 0x107   :  { %v72_v37 = vmul.f32 %v342_v34, %v71_v36  ;;  %v69_v38 = vsel %vm68_vm4, %v340_v28, %v65_v35 }
 0x108   :  { %v80_v41 = vmul.f32 %v69_v38, %v46_v13 }
 0x109   :  { %v73_v39 = vmul.f32 0.5, %v72_v37 }
 0x10a   :  { %v86_v46 = vmul.f32 %v333_v42, %v80_v41 }
 0x10b   :  { %v74_v40 = vsub.f32 1.5, %v73_v39 }
 0x10c   :  { %v92_v49 = vadd.f32 %v334_v47, %v86_v46 }
 0x10d   :  { %v75_v43 = vmul.f32 %v342_v34, %v74_v40 }
 0x10f   :  { %v79_v44 = vsel %vm78_vm7, %v342_v34, %v75_v43 }
 0x110   :  { %v81_v45 = vmul.f32 %v79_v44, %v47_v18 }
 0x112   :  { %v87_v48 = vmul.f32 %v333_v42, %v81_v45 }
 0x114   :  { %v93_v50 = vadd.f32 %v334_v47, %v87_v48 }
 0x116   :  { %v94_v51 = vpack.c.bf16 %v93_v50, %v92_v49 }
 0x118   :  { %303 = vmatmul.msk.bf16.vlgmr.msra.gmra.mxu0 %vm30_vm0, %v94_v51 }
 0x195   :  { %v127_v53 = vpop.f32.mrf.mxu0 }
 0x196   :  { %v443_v54 = vadd.f32 %v335_v52, %v127_v53 }
 0x198   :  { %v446_v55 = vmul.f32 0.70710677, %v443_v54 }
 0x19a   :  { %v136_v56 = vmul.f32 %v446_v55, %v446_v55 }
 0x19c   :  { %v137_v57 = vmin.f32 %v136_v56, 16.0 }
 0x19d   :  { %v129_v58 = vpop.f32.mrf.mxu0 }
 0x19e   :  { %v138_v59 = vmul.f32 2.1237322e-06, %v137_v57  ;;  %v149_v60 = vmul.f32 3.8918573e-05, %v137_v57  ;;  %v450_v61 = vadd.f32 %v335_v52, %v129_v58 }
 0x1a0   :  { %v139_v62 = vadd.f32 0.00028619796, %v138_v59  ;;  %v150_v63 = vadd.f32 0.001143296, %v149_v60  ;;  %v453_v0 = vmul.f32 0.70710677, %v450_v61 }
 0x1a2   :  { %v151_v1 = vmul.f32 %v150_v63, %v137_v57  ;;  %v176_v2 = vmul.f32 %v453_v0, %v453_v0  ;;  %v140_v3 = vmul.f32 %v139_v62, %v137_v57 }
 0x1a4   :  { %v152_v4 = vadd.f32 0.014752088, %v151_v1  ;;  %v177_v5 = vmin.f32 %v176_v2, 16.0  ;;  %v141_v10 = vadd.f32 0.0036580483, %v140_v3 }
 0x1a6   :  { %v153_v6 = vmul.f32 %v152_v4, %v137_v57  ;;  %v178_v8 = vmul.f32 2.1237322e-06, %v177_v5  ;;  %v189_v9 = vmul.f32 3.8918573e-05, %v177_v5  ;;  %v142_v18 = vmul.f32 %v141_v10, %v137_v57 }
 0x1a7   :  { %v133_v10 = vmul.f32 0.5, %v450_v61 }
 0x1a8   :  { %v154_v11 = vadd.f32 0.112945676, %v153_v6  ;;  %v179_v12 = vadd.f32 0.00028619796, %v178_v8  ;;  %v190_v13 = vadd.f32 0.001143296, %v189_v9 }
 0x1a9   :  { %v143_v25 = vadd.f32 0.05243302, %v142_v18  ;;  %v132_v9 = vmul.f32 0.5, %v443_v54 }
 0x1aa   :  { %v155_v14 = vmul.f32 %v154_v11, %v137_v57  ;;  %v180_v16 = vmul.f32 %v179_v12, %v177_v5  ;;  %v191_v17 = vmul.f32 %v190_v13, %v177_v5 }
 0x1ab   :  { %v144_v31 = vmul.f32 %v143_v25, %v137_v57 }
 0x1ac   :  { %v156_v19 = vadd.f32 0.4994258, %v155_v14  ;;  %v181_v20 = vadd.f32 0.0036580483, %v180_v16  ;;  %v192_v21 = vadd.f32 0.014752088, %v191_v17 }
 0x1ad   :  { %v145_v36 = vadd.f32 0.18741608, %v144_v31 }
 0x1ae   :  { %v157_v22 = vmul.f32 %v156_v19, %v137_v57  ;;  %v193_v24 = vmul.f32 %v192_v21, %v177_v5  ;;  %v182_v27 = vmul.f32 %v181_v20, %v177_v5 }
 0x1af   :  { %v146_v41 = vmul.f32 %v145_v36, %v137_v57 }
 0x1b0   :  { %v158_v26 = vadd.f32 1.0, %v157_v22  ;;  %v194_v28 = vadd.f32 0.112945676, %v193_v24  ;;  %v183_v32 = vadd.f32 0.05243302, %v182_v27 }
 0x1b1   :  { %v147_v47 = vadd.f32 1.1283791, %v146_v41 }
 0x1b2   :  { %343 = vrcp.f32 %v158_v26  ;;  %v195_v30 = vmul.f32 %v194_v28, %v177_v5  ;;  %v184_v38 = vmul.f32 %v183_v32, %v177_v5  ;;  %v170_v43 = vand.u32 2147483648, %v158_v26 }
 0x1b3   :  { %v168_v45 = vand.u32 2147483647, %v158_v26  ;;  %vm164_vm9 = vweird.f32 %v158_v26  ;;  %v148_v56 = vmul.f32 %v147_v47, %v446_v55 }
 0x1b4   :  { %v196_v33 = vadd.f32 0.4994258, %v195_v30  ;;  %v185_v44 = vadd.f32 0.18741608, %v184_v38  ;;  %v171_v50 = vor.u32 1.1754944e-38, %v170_v43 }
 0x1b5   :  { %vm169_vm11 = vcmp.eq.f32.partialorder %v168_v45, 8.507059e+37 }
 0x1b6   :  { %v197_v34 = vmul.f32 %v196_v33, %v177_v5  ;;  %v186_v51 = vmul.f32 %v185_v44, %v177_v5 }
 0x1b8   :  { %v344_v35 = vpop.eup %343  ;;  %v198_v39 = vadd.f32 1.0, %v197_v34  ;;  %v187_v57 = vadd.f32 1.1283791, %v186_v51 }
 0x1b9   :  { %v160_v37 = vmul.f32 %v344_v35, %v158_v26  ;;  %vm165_vm8 = vweird.f32 %v344_v35 }
 0x1ba   :  { %345 = vrcp.f32 %v198_v39  ;;  %vm166_vm10 = vmor %vm164_vm9, %vm165_vm8  ;;  %v210_v59 = vand.u32 2147483648, %v198_v39  ;;  %v208_v63 = vand.u32 2147483647, %v198_v39  ;;  %vm204_vm13 = vweird.f32 %v198_v39 }
 0x1bb   :  { %v161_v40 = vsub.f32 1.0, %v160_v37  ;;  %v188_v4 = vmul.f32 %v187_v57, %v453_v0  ;;  %v336_v0 = vld [vmem:[%s487_s6] ss:$0 sm:$0xff] }
 0x1bc   :  { %v211_v2 = vor.u32 1.1754944e-38, %v210_v59  ;;  %vm209_vm15 = vcmp.eq.f32.partialorder %v208_v63, 8.507059e+37 }
 0x1bd   :  { %v162_v42 = vmul.f32 %v344_v35, %v161_v40 }
 0x1bf   :  { %v163_v46 = vadd.f32 %v344_v35, %v162_v42 }
 0x1c0   :  { %v346_v48 = vpop.eup %345 }
 0x1c1   :  { %v167_v49 = vsel %vm166_vm10, %v344_v35, %v163_v46  ;;  %v200_v52 = vmul.f32 %v346_v48, %v198_v39  ;;  %vm205_vm12 = vweird.f32 %v346_v48 }
 0x1c2   :  { %v172_v53 = vsel %vm169_vm11, %v171_v50, %v167_v49  ;;  %vm206_vm14 = vmor %vm204_vm13, %vm205_vm12 }
 0x1c3   :  { %v201_v58 = vsub.f32 1.0, %v200_v52  ;;  %v173_v60 = vmul.f32 %v172_v53, %v148_v56 }
 0x1c5   :  { %v202_v62 = vmul.f32 %v346_v48, %v201_v58  ;;  %v304_v3 = vclamps-f32 %v173_v60, 1.0 }
 0x1c7   :  { %v203_v1 = vadd.f32 %v346_v48, %v202_v62  ;;  %v216_v8 = vadd.f32 1.0, %v304_v3 }
 0x1c9   :  { %v207_v5 = vsel %vm206_vm14, %v346_v48, %v203_v1  ;;  %v218_v12 = vmul.f32 %v216_v8, %v132_v9 }
 0x1ca   :  { %v212_v6 = vsel %vm209_vm15, %v211_v2, %v207_v5 }
 0x1cb   :  { %v213_v7 = vmul.f32 %v212_v6, %v188_v4 }
 0x1cd   :  { %v305_v55 = vclamps-f32 %v213_v7, 1.0 }
 0x1cf   :  { %v217_v11 = vadd.f32 1.0, %v305_v55 }
 0x1d1   :  { %v219_v13 = vmul.f32 %v217_v11, %v133_v10 }
 0x1d3   :  { %v220_v14 = vpack.c.bf16 %v219_v13, %v218_v12 }
 0x1d5   :  { %322 = vmatmul.msk.bf16.vlgmr.msra.gmra.mxu1 %vm257_vm1, %v220_v14 }
 0x252   :  { %v270_v15 = vpop.f32.mrf.mxu1 }
 0x253   :  { %v271_v16 = vadd.f32 %v336_v0, %v270_v15 }
 0x255   :  { %275 = vst.msk [vmem:[#allocation2] sm:$0xff] %vm30_vm0, %v271_v16 }
 0x25a   :  { %v272_v54 = vpop.f32.mrf.mxu1 }
 0x25b   :  { %v273_v61 = vadd.f32 %v336_v0, %v272_v54 }
 0x25d   :  { %276 = vst.msk [vmem:[#allocation2 + $0x8] sm:$0xff] %vm30_vm0, %v273_v61 }
 0x25e   :  { %289 = dma.vmem_to_hbm [thread:$0]  %s282_s20, 256, %s284_s23, [#allocation3], %s375_s24, %s375_s24, %s376_s25  }
 0x25f   :  { %371 = dma.done.wait [#allocation3], 256  }
 0x260   :  { %372 = vsyncadd [#allocation3], 4294967040 }
 0x261   :  { %294 = vsyncpa [#allocation3], 1 }

</bundles_post_ra>
